<compile_context>
chip_gen: v7x
topology: tpu7x:2x2x1
jax: 0.10.0
libtpu: 0.0.40
codegen_flags: <defaults>
</compile_context>

<pallas_src>
import functools

import jax
import jax.numpy as jnp
import numpy as np
from jax import lax
from jax.experimental import pallas as pl
from jax.experimental.pallas import tpu as pltpu


def _round_up(x, m):
    return (x + m - 1) // m * m


# ---------------------------------------------------------------------------
# Pass 0: per-feature sum / sum-of-squares of x (BatchNorm0 batch statistics).
# Output blocks are revisited every step (accumulator) -> grid axis "arbitrary".
# ---------------------------------------------------------------------------
def _col_stats_kernel(x_ref, sum_ref, sq_ref):
    @pl.when(pl.program_id(0) == 0)
    def _():
        sum_ref[...] = jnp.zeros_like(sum_ref)
        sq_ref[...] = jnp.zeros_like(sq_ref)

    x = x_ref[...]
    sum_ref[...] += jnp.sum(x, axis=0, keepdims=True)
    sq_ref[...] += jnp.sum(x * x, axis=0, keepdims=True)


# ---------------------------------------------------------------------------
# Pass 1: h = dropout(relu(x @ W1_eff + b1_eff)); also accumulates per-feature
# sum / sumsq of h for BatchNorm1. BN0 is already folded into W1_eff / b1_eff.
# ---------------------------------------------------------------------------
def _fc1_body(x_ref, w1_ref, b1_ref, bits_ref, h_ref, sum_ref, sq_ref,
              *, n_rows, block_rows, keep_thr, drop_scale):
    @pl.when(pl.program_id(0) == 0)
    def _():
        sum_ref[...] = jnp.zeros_like(sum_ref)
        sq_ref[...] = jnp.zeros_like(sq_ref)

    xb = x_ref[...].astype(jnp.bfloat16)                 # bf16 MXU fast path
    h = jnp.dot(xb, w1_ref[...], preferred_element_type=jnp.float32)
    h = h + b1_ref[...]
    h = jnp.maximum(h, 0.0)

    if bits_ref is not None:                             # dropout (training mode)
        keep = bits_ref[...] >= jnp.uint32(keep_thr)
        h = jnp.where(keep, h * drop_scale, 0.0)

    if n_rows % block_rows != 0:                         # zero padded batch rows
        row = (pl.program_id(0) * block_rows
               + lax.broadcasted_iota(jnp.int32, (block_rows, 1), 0))
        h = jnp.where(row < n_rows, h, 0.0)

    hb = h.astype(jnp.bfloat16)                          # bf16 intermediate in HBM
    h_ref[...] = hb
    hf = hb.astype(jnp.float32)
    sum_ref[...] += jnp.sum(hf, axis=0, keepdims=True)
    sq_ref[...] += jnp.sum(hf * hf, axis=0, keepdims=True)


# ---------------------------------------------------------------------------
# Pass 2: y = relu(h @ W2_eff + b2_eff).  BN1 folded into W2_eff / b2_eff.
# ---------------------------------------------------------------------------
def _fc2_kernel(h_ref, w2_ref, b2_ref, y_ref):
    y = jnp.dot(h_ref[...], w2_ref[...], preferred_element_type=jnp.float32)
    y_ref[...] = jnp.maximum(y + b2_ref[...], 0.0)


def gcn_mlp_forward(x, params, *, dropout_p, rng_key=None, training=True,
                    eps=1e-5, block_rows=512):
    n, in_dim = x.shape
    mid_dim = params["w1"].shape[1]
    las_dim = params["w2"].shape[1]

    f32 = jnp.float32
    in_p = _round_up(in_dim, 128)
    mid_p = _round_up(mid_dim, 128)
    las_p = _round_up(las_dim, 128)
    tm = min(block_rows, _round_up(n, 8))          # rows per grid step
    n_pad = _round_up(n, tm)
    n_tiles = n_pad // tm

    # Zero-pad everything to tile-aligned, lane-dense shapes.
    x_p = jnp.zeros((n_pad, in_p), f32).at[:n, :in_dim].set(x.astype(f32))
    w1_p = jnp.zeros((in_p, mid_p), f32).at[:in_dim, :mid_dim].set(params["w1"])
    b1_p = jnp.zeros((1, mid_p), f32).at[:, :mid_dim].set(params["b1"].reshape(1, -1))
    w2_p = jnp.zeros((mid_p, las_p), f32).at[:mid_dim, :las_dim].set(params["w2"])
    b2_p = jnp.zeros((1, las_p), f32).at[:, :las_dim].set(params["b2"].reshape(1, -1))
    g0_p = jnp.zeros((1, in_p), f32).at[:, :in_dim].set(params["gamma0"].reshape(1, -1))
    be0_p = jnp.zeros((1, in_p), f32).at[:, :in_dim].set(params["beta0"].reshape(1, -1))
    g1_p = jnp.zeros((1, mid_p), f32).at[:, :mid_dim].set(params["gamma1"].reshape(1, -1))
    be1_p = jnp.zeros((1, mid_p), f32).at[:, :mid_dim].set(params["beta1"].reshape(1, -1))

    vmem_budget = 48 * 1024 * 1024
    cp_arb = pltpu.CompilerParams(dimension_semantics=("arbitrary",),
                                  vmem_limit_bytes=vmem_budget)
    cp_par = pltpu.CompilerParams(dimension_semantics=("parallel",),
                                  vmem_limit_bytes=vmem_budget)

    # ---- pass 0: BN0 batch statistics ----
    sum0, sq0 = pl.pallas_call(
        _col_stats_kernel,
        grid=(n_tiles,),
        in_specs=[pl.BlockSpec((tm, in_p), lambda i: (i, 0))],
        out_specs=[pl.BlockSpec((1, in_p), lambda i: (0, 0)),
                   pl.BlockSpec((1, in_p), lambda i: (0, 0))],
        out_shape=[jax.ShapeDtypeStruct((1, in_p), f32),
                   jax.ShapeDtypeStruct((1, in_p), f32)],
        compiler_params=cp_arb,
    )(x_p)

    inv_n = 1.0 / n
    mean0 = sum0 * inv_n
    var0 = jnp.maximum(sq0 * inv_n - mean0 * mean0, 0.0)   # biased var (training BN)
    s0 = g0_p * lax.rsqrt(var0 + eps)
    t0 = be0_p - mean0 * s0
    # Fold BN0 into fc1: x @ (s0*W1) + (b1 + t0 @ W1)  ==  ((x-mean)*inv_std*g+b) @ W1 + b1
    w1_eff = (w1_p * s0.reshape(in_p, 1)).astype(jnp.bfloat16)
    b1_eff = b1_p + t0 @ w1_p

    # ---- pass 1: fc1 + ReLU + dropout (+ BN1 statistics) ----
    apply_dropout = bool(training) and float(dropout_p) > 0.0
    if apply_dropout:
        if rng_key is None:
            rng_key = jax.random.PRNGKey(0)
        bits = jax.random.bits(rng_key, (n_pad, mid_p), dtype=jnp.uint32)
        keep_thr = min(int(round(float(dropout_p) * 4294967296.0)), 4294967295)
        drop_scale = 1.0 / (1.0 - float(dropout_p))
        body = functools.partial(_fc1_body, n_rows=n, block_rows=tm,
                                 keep_thr=keep_thr, drop_scale=drop_scale)
        kernel1 = body                                           # takes bits_ref
        extra_args = [bits]
        extra_specs = [pl.BlockSpec((tm, mid_p), lambda i: (i, 0))]
    else:
        body = functools.partial(_fc1_body, n_rows=n, block_rows=tm,
                                 keep_thr=0, drop_scale=1.0)
        kernel1 = lambda x_r, w_r, b_r, h_r, s_r, q_r: body(x_r, w_r, b_r, None,
                                                            h_r, s_r, q_r)
        extra_args = []
        extra_specs = []

    h_pad, sum1, sq1 = pl.pallas_call(
        kernel1,
        grid=(n_tiles,),
        in_specs=[pl.BlockSpec((tm, in_p), lambda i: (i, 0)),
                  pl.BlockSpec((in_p, mid_p), lambda i: (0, 0)),   # resident weights
                  pl.BlockSpec((1, mid_p), lambda i: (0, 0))] + extra_specs,
        out_specs=[pl.BlockSpec((tm, mid_p), lambda i: (i, 0)),
                   pl.BlockSpec((1, mid_p), lambda i: (0, 0)),
                   pl.BlockSpec((1, mid_p), lambda i: (0, 0))],
        out_shape=[jax.ShapeDtypeStruct((n_pad, mid_p), jnp.bfloat16),
                   jax.ShapeDtypeStruct((1, mid_p), f32),
                   jax.ShapeDtypeStruct((1, mid_p), f32)],
        compiler_params=cp_arb,      # stats accumulate across N tiles
    )(x_p, w1_eff, b1_eff, *extra_args)

    mean1 = sum1 * inv_n
    var1 = jnp.maximum(sq1 * inv_n - mean1 * mean1, 0.0)
    s1 = g1_p * lax.rsqrt(var1 + eps)
    t1 = be1_p - mean1 * s1
    w2_eff = (w2_p * s1.reshape(mid_p, 1)).astype(jnp.bfloat16)
    b2_eff = b2_p + t1 @ w2_p

    # ---- pass 2: fc2 + ReLU (lane-dense 128-wide output, sliced afterwards) ----
    y_pad = pl.pallas_call(
        _fc2_kernel,
        grid=(n_tiles,),
        in_specs=[pl.BlockSpec((tm, mid_p), lambda i: (i, 0)),
                  pl.BlockSpec((mid_p, las_p), lambda i: (0, 0)),
                  pl.BlockSpec((1, las_p), lambda i: (0, 0))],
        out_specs=pl.BlockSpec((tm, las_p), lambda i: (i, 0)),
        out_shape=jax.ShapeDtypeStruct((n_pad, las_p), f32),
        compiler_params=cp_par,
    )(h_pad, w2_eff, b2_eff)

    return y_pad[:n, :las_dim]


def init_params(key, in_dim, mid_dim, las_dim):
    k1, k2, k3, k4 = jax.random.split(key, 4)

    def xavier_uniform(k, fan_in, fan_out):
        limit = (6.0 / (fan_in + fan_out)) ** 0.5
        # stored as (in, out): kernel computes x @ W  (== torch's x @ weight.T)
        return jax.random.uniform(k, (fan_in, fan_out), jnp.float32, -limit, limit)

    return {
        "w1": xavier_uniform(k1, in_dim, mid_dim),
        "b1": jax.random.normal(k2, (mid_dim,), jnp.float32) * 1e-5,
        "w2": xavier_uniform(k3, mid_dim, las_dim),
        "b2": jax.random.normal(k4, (las_dim,), jnp.float32) * 1e-5,
        # BatchNorm1d affine params (PyTorch default: weight=1, bias=0)
        "gamma0": jnp.ones((in_dim,), jnp.float32),
        "beta0": jnp.zeros((in_dim,), jnp.float32),
        "gamma1": jnp.ones((mid_dim,), jnp.float32),
        "beta1": jnp.zeros((mid_dim,), jnp.float32),
    }


def _reference_forward(x, params, *, dropout_p, training, eps=1e-5):
    """Pure-JAX reference (training-mode BN, dropout disabled)."""
    def bn(v, gamma, beta):
        mean = v.mean(0, keepdims=True)
        var = ((v - mean) ** 2).mean(0, keepdims=True)
        return (v - mean) / jnp.sqrt(var + eps) * gamma.reshape(1, -1) + beta.reshape(1, -1)

    h = jnp.maximum(bn(x, params["gamma0"], params["beta0"]) @ params["w1"]
                    + params["b1"].reshape(1, -1), 0.0)
    # dropout omitted in the reference (only used with training=False)
    y = jnp.maximum(bn(h, params["gamma1"], params["beta1"]) @ params["w2"]
                    + params["b2"].reshape(1, -1), 0.0)
    return y


if __name__ == "__main__":
    N, IN_DIM, MID_DIM, LAS_DIM = 8, 32, 128, 32
    DROPOUT = 0.5

    key = jax.random.PRNGKey(0)
    kx, kp, kd = jax.random.split(key, 3)
    x = jax.random.normal(kx, (N, IN_DIM), jnp.float32)
    params = init_params(kp, IN_DIM, MID_DIM, LAS_DIM)

    # Correctness sanity check with dropout disabled (deterministic path);
    # loose tolerance because the kernel runs the matmuls in bf16.
    y_eval = gcn_mlp_forward(x, params, dropout_p=DROPOUT, training=False)
    y_ref = _reference_forward(x, params, dropout_p=DROPOUT, training=False)
    y_eval_np = np.asarray(jax.block_until_ready(y_eval))
    y_ref_np = np.asarray(y_ref)
    rel_err = np.linalg.norm(y_eval_np - y_ref_np) / (np.linalg.norm(y_ref_np) + 1e-6)
    assert rel_err < 0.15, f"relative error too large: {rel_err}"

    # Training-mode forward (batch-stat BN + dropout), as the module defaults to.
    out = gcn_mlp_forward(x, params, dropout_p=DROPOUT, rng_key=kd, training=True)
    out = jax.block_until_ready(out)
    assert out.shape == (N, LAS_DIM)
    print("KERNEL_OK")
</pallas_src>

<mosaic_0001>
module attributes {stable_mosaic.version = 11 : i64} {
  func.func @_col_stats_kernel(%arg0: i32, %arg1: memref<8x128xf32, #tpu.memory_space<vmem>>, %arg2: memref<1x128xf32, #tpu.memory_space<vmem>>, %arg3: memref<1x128xf32, #tpu.memory_space<vmem>>) attributes {dimension_semantics = [#tpu.dimension_semantics<arbitrary>], iteration_bounds = array<i64: 1>, scalar_prefetch = 0 : i64, scratch_operands = 0 : i64, tpu.core_type = #tpu.core_type<tc>, window_params = [{transform_indices = @transform_0, window_bounds = array<i64: 8, 128>}, {pipeline_mode = #tpu.pipeline_mode<synchronous>, transform_indices = @transform_1, window_bounds = array<i64: 1, 128>}, {pipeline_mode = #tpu.pipeline_mode<synchronous>, transform_indices = @transform_2, window_bounds = array<i64: 1, 128>}]} {
    %c0_i32 = arith.constant 0 : i32
    %0 = arith.cmpi eq, %arg0, %c0_i32 : i32
    %1 = arith.extui %0 : i1 to i32
    %c0_i32_0 = arith.constant 0 : i32
    %2 = arith.cmpi ne, %1, %c0_i32_0 : i32
    scf.if %2 {
      %cst_11 = arith.constant 0.000000e+00 : f32
      %15 = vector.broadcast %cst_11 : f32 to vector<1x128xf32>
      %c0_12 = arith.constant 0 : index
      %c0_13 = arith.constant 0 : index
      %16 = vector.load %arg2[%c0_12, %c0_13] : memref<1x128xf32, #tpu.memory_space<vmem>>, vector<1x128xf32>
      tpu.vector_store %arg2[%c0_12, %c0_13], %15 {strides = array<i32>} : memref<1x128xf32, #tpu.memory_space<vmem>>, vector<1x128xf32>,
      %cst_14 = arith.constant 0.000000e+00 : f32
      %17 = vector.broadcast %cst_14 : f32 to vector<1x128xf32>
      %c0_15 = arith.constant 0 : index
      %c0_16 = arith.constant 0 : index
      %18 = vector.load %arg3[%c0_15, %c0_16] : memref<1x128xf32, #tpu.memory_space<vmem>>, vector<1x128xf32>
      tpu.vector_store %arg3[%c0_15, %c0_16], %17 {strides = array<i32>} : memref<1x128xf32, #tpu.memory_space<vmem>>, vector<1x128xf32>,
    } else {
    }
    %c0 = arith.constant 0 : index
    %c0_1 = arith.constant 0 : index
    %3 = vector.load %arg1[%c0, %c0_1] : memref<8x128xf32, #tpu.memory_space<vmem>>, vector<8x128xf32>
    %c0_2 = arith.constant 0 : index
    %c0_3 = arith.constant 0 : index
    %4 = vector.load %arg2[%c0_2, %c0_3] : memref<1x128xf32, #tpu.memory_space<vmem>>, vector<1x128xf32>
    %cst = arith.constant dense<0.000000e+00> : vector<128xf32>
    %5 = vector.multi_reduction <add>, %3, %cst [0] : vector<8x128xf32> to vector<128xf32>
    %6 = vector.shape_cast %5 : vector<128xf32> to vector<1x128xf32>
    %7 = arith.addf %4, %6 : vector<1x128xf32>
    %c0_4 = arith.constant 0 : index
    %c0_5 = arith.constant 0 : index
    %8 = vector.load %arg2[%c0_4, %c0_5] : memref<1x128xf32, #tpu.memory_space<vmem>>, vector<1x128xf32>
    tpu.vector_store %arg2[%c0_4, %c0_5], %7 {strides = array<i32>} : memref<1x128xf32, #tpu.memory_space<vmem>>, vector<1x128xf32>,
    %c0_6 = arith.constant 0 : index
    %c0_7 = arith.constant 0 : index
    %9 = vector.load %arg3[%c0_6, %c0_7] : memref<1x128xf32, #tpu.memory_space<vmem>>, vector<1x128xf32>
    %10 = arith.mulf %3, %3 : vector<8x128xf32>
    %cst_8 = arith.constant dense<0.000000e+00> : vector<128xf32>
    %11 = vector.multi_reduction <add>, %10, %cst_8 [0] : vector<8x128xf32> to vector<128xf32>
    %12 = vector.shape_cast %11 : vector<128xf32> to vector<1x128xf32>
    %13 = arith.addf %9, %12 : vector<1x128xf32>
    %c0_9 = arith.constant 0 : index
    %c0_10 = arith.constant 0 : index
    %14 = vector.load %arg3[%c0_9, %c0_10] : memref<1x128xf32, #tpu.memory_space<vmem>>, vector<1x128xf32>
    tpu.vector_store %arg3[%c0_9, %c0_10], %13 {strides = array<i32>} : memref<1x128xf32, #tpu.memory_space<vmem>>, vector<1x128xf32>,
    return
  }
  func.func @transform_0(%arg0: i32) -> (i32, i32) {
    %c0_i32 = arith.constant 0 : i32
    %c0_i32_0 = arith.constant 0 : i32
    return %arg0, %c0_i32 : i32, i32
  }
  func.func @transform_1(%arg0: i32) -> (i32, i32) {
    %c0_i32 = arith.constant 0 : i32
    %c0_i32_0 = arith.constant 0 : i32
    %c0_i32_1 = arith.constant 0 : i32
    return %c0_i32, %c0_i32_0 : i32, i32
  }
  func.func @transform_2(%arg0: i32) -> (i32, i32) {
    %c0_i32 = arith.constant 0 : i32
    %c0_i32_0 = arith.constant 0 : i32
    %c0_i32_1 = arith.constant 0 : i32
    return %c0_i32, %c0_i32_0 : i32, i32
  }
}

</mosaic_0001>

<bundles_post_ra>
// kernel: tpu_custom_call.1
= control target key start
LH: loop header
LB: loop body
LE: loop exit
PB: predicated region body
PF: predicated region fallthrough
CT: control target
= control target key end

     0   :  { %8 = vsyncpa [#allocation3], 0  ;;  %s218_s0 = inlined_call_operand.hbm [shape: f32[8,128], index: 0, kind: input, shape index: {}]   ;;  %s219_s1 = inlined_call_operand.hbm [shape: f32[1,128], index: 1, kind: output, shape index: {0}]   ;;  %s220_s2 = inlined_call_operand.hbm [shape: f32[1,128], index: 2, kind: output, shape index: {1}]  }
   0x1   :  { %9 = vsyncpa [#allocation4], 0 }
   0x2   :  { %10 = vsyncpa [#allocation7], 0  ;;  %s155_s9 = smov [#allocation2]   ;;  %s83_s13 = scalar_lea.hbm %s218_s0, 128 }
   0x3   :  { %s17_s10 = sshll.u32 %s155_s9, 4  ;;  %p84_p0 = scmp.ne.s32.totalorder %s218_s0, %s83_s13  ;;  %s18_s10 = int_to_ptr.vmem [resolvable:$true] %s17_s10 }
   0x4   :  { %p87_p1 = scmp.lt.u32.totalorder %s83_s13, %s218_s0 }
   0x6   :  { %p89_p2 = pnand %p87_p1, %p84_p0 }
   0x8   :  { %92 = shalt.err (!%p89_p2)
}
   0x9   :  { %s93_s18 = scalar_lea.vmem %s18_s10, 128  ;;  %p98_p4 = scmp.lt.s32.totalorder %s18_s10, %s18_s10 }
   0xa   :  { %p94_p3 = scmp.ne.s32.totalorder %s18_s10, %s93_s18  ;;  %p99_p5 = scmp.lt.s32.totalorder %s93_s18, %s93_s18 }
   0xc   :  { %p100_p6 = por %p99_p5, %p98_p4 }
   0xe   :  { %p101_p7 = pnand %p100_p6, %p94_p3 }
  0x10   :  { %104 = shalt.err (!%p101_p7)
}
  0x11   :  { %20 = dma.hbm_to_vmem [thread:$0]  %s218_s0, 128, %s18_s10, [#allocation3]  }
  0x12   :  { %149 = dma.done.wait [#allocation3], 128  }
  0x13   :  { %150 = vsyncadd [#allocation3], 4294967168  ;;  %v156_v0 = vmov 0.0   ;;  %v30_v1 = vld [vmem:[#allocation2] sm:$0xff]  ;;  %s157_s21 = smov [#allocation5]   ;;  %s158_s0 = smov [#allocation6]  }
  0x14   :  { %28 = vst [vmem:[#allocation5] sm:$0x1] %v156_v0  ;;  %29 = vst [vmem:[#allocation6] sm:$0x1] %v156_v0  ;;  %v32_v2 = vrot.slane %v30_v1, 4  ;;  %v41_v3 = vmul.f32 %v30_v1, %v30_v1  ;;  %s56_s22 = sshll.u32 %s157_s21, 4  ;;  %s57_s22 = int_to_ptr.vmem [resolvable:$true] %s56_s22 }
  0x15   :  { %s66_s23 = sshll.u32 %s158_s0, 4  ;;  %s105_s24 = scalar_lea.vmem %s57_s22, 16  ;;  %s186_s23 = int_to_ptr.vmem [resolvable:$true] %s66_s23 }
  0x16   :  { %v33_v4 = vadd.f32 %v32_v2, %v30_v1  ;;  %v42_v5 = vrot.slane %v41_v3, 4  ;;  %p106_p8 = scmp.ne.s32.totalorder %s57_s22, %s105_s24  ;;  %s109_s25 = scalar_lea.vmem %s57_s22, 32 }
  0x17   :  { %p110_p9 = scmp.lt.s32.totalorder %s57_s22, %s57_s22  ;;  %p111_p10 = scmp.lt.s32.totalorder %s109_s25, %s105_s24 }
  0x18   :  { %v34_v6 = vrot.slane %v33_v4, 2  ;;  %v43_v7 = vadd.f32 %v42_v5, %v41_v3 }
  0x19   :  { %p112_p11 = por %p111_p10, %p110_p9 }
  0x1a   :  { %v35_v8 = vadd.f32 %v34_v6, %v33_v4  ;;  %v44_v9 = vrot.slane %v43_v7, 2 }
  0x1b   :  { %v31_v12 = vld [vmem:[#allocation5] sm:$0x1]  ;;  %v40_v15 = vld [vmem:[#allocation6] sm:$0x1]  ;;  %p113_p12 = pnand %p112_p11, %p106_p8 }
  0x1c   :  { %v36_v10 = vrot.slane %v35_v8, 1  ;;  %v45_v11 = vadd.f32 %v44_v9, %v43_v7 }
  0x1e   :  { %v37_v13 = vadd.f32 %v36_v10, %v35_v8  ;;  %v46_v14 = vrot.slane %v45_v11, 1 }
  0x20   :  { %v38_v16 = vadd.f32 %v37_v13, %v31_v12  ;;  %v47_v17 = vadd.f32 %v46_v14, %v45_v11 }
  0x22   :  { %39 = vst [vmem:[#allocation5] sm:$0x1] %v38_v16  ;;  %v48_v18 = vadd.f32 %v47_v17, %v40_v15 }
  0x23   :  { %116 = shalt.err (!%p113_p12)
}
  0x24   :  { %s117_s28 = scalar_lea.hbm %s219_s1, 16 }
  0x25   :  { %p118_p13 = scmp.ne.s32.totalorder %s219_s1, %s117_s28  ;;  %p121_p0 = scmp.lt.u32.totalorder %s117_s28, %s219_s1 }
  0x27   :  { %p123_p1 = pnand %p121_p0, %p118_p13 }
  0x29   :  { %126 = shalt.err (!%p123_p1)
}
  0x2a   :  { %59 = dma.vmem_to_hbm [thread:$0]  %s57_s22, 16, %s219_s1, [#allocation4]   ;;  %49 = vst [vmem:[#allocation6] sm:$0x1] %v48_v18 }
  0x2b   :  { %s127_s7 = scalar_lea.vmem %s186_s23, 16  ;;  %s131_s8 = scalar_lea.vmem %s186_s23, 32 }
  0x2c   :  { %p128_p2 = scmp.ne.s32.totalorder %s186_s23, %s127_s7  ;;  %p132_p3 = scmp.lt.s32.totalorder %s186_s23, %s186_s23 }
  0x2d   :  { %p133_p4 = scmp.lt.s32.totalorder %s131_s8, %s127_s7 }
  0x2f   :  { %p134_p5 = por %p133_p4, %p132_p3 }
  0x31   :  { %p135_p6 = pnand %p134_p5, %p128_p2 }
  0x33   :  { %138 = shalt.err (!%p135_p6)
}
  0x34   :  { %s139_s11 = scalar_lea.hbm %s220_s2, 16 }
  0x35   :  { %p140_p7 = scmp.ne.s32.totalorder %s220_s2, %s139_s11  ;;  %p143_p8 = scmp.lt.u32.totalorder %s139_s11, %s220_s2 }
  0x37   :  { %p145_p9 = pnand %p143_p8, %p140_p7 }
  0x39   :  { %148 = shalt.err (!%p145_p9)
}
  0x3a   :  { %69 = dma.vmem_to_hbm [thread:$0]  %s186_s23, 16, %s220_s2, [#allocation7]  }
  0x3b   :  { %151 = dma.done.wait [#allocation4], 16  }
  0x3c   :  { %152 = vsyncadd [#allocation4], 4294967280 }
  0x3d   :  { %153 = dma.done.wait [#allocation7], 16  }
  0x3e   :  { %154 = vsyncadd [#allocation7], 4294967280 }
  0x3f   :  { %76 = vsyncpa [#allocation3], 1 }
  0x40   :  { %77 = vsyncpa [#allocation4], 1 }
  0x41   :  { %78 = vsyncpa [#allocation7], 1 }

</bundles_post_ra>
